<compile_context>
chip_gen: v6e
topology: v6e:2x2x1
jax: 0.10.0
libtpu: 0.0.40
codegen_flags: <defaults>
</compile_context>

<pallas_src>
import functools

import jax
import jax.numpy as jnp
from jax.experimental import pallas as pl
from jax.experimental.pallas import tpu as pltpu

_LANE = 128
_SUBLANE = 8


def _round_up(x, m):
    return ((x + m - 1) // m) * m


def _vmem_capacity_bytes():
    try:
        return int(pltpu.get_tpu_info().vmem_capacity_bytes)
    except Exception:
        return 64 << 20          # conservative fallback: v7x per-TensorCore VMEM


def _footprint_bytes(tm, v, n_pad, a_pad, in_bytes, out_bytes):
    # before/action/out are pipelined (double-buffered); weights are resident (single buffer).
    return (2 * tm * v * in_bytes            # before
            + 2 * tm * 1 * 4                 # action
            + 2 * tm * n_pad * out_bytes     # pred
            + v * n_pad * 2                  # Wv      (bf16)
            + a_pad * n_pad * 2)             # Wa + b  (bf16)


def _choose_tile_m(batch, v, n_pad, a_pad, in_bytes, out_bytes, budget):
    """Largest batch tile that fits the VMEM budget; >=2 grid steps for big batches (v7x 2 TCs)."""
    if batch <= _LANE:
        return batch
    cands = [tm for tm in (1024, 512, 256, 128) if tm <= batch]
    if batch >= 2 * _LANE:
        cap = max(_LANE, (batch // 2) // _LANE * _LANE)
        cands = sorted({min(tm, cap) for tm in cands}, reverse=True)
    for tm in cands:
        if _footprint_bytes(tm, v, n_pad, a_pad, in_bytes, out_bytes) <= budget:
            return tm
    # TODO(synk): for weights so large that even tile_m=128 exceeds the budget (huge V on
    # v7x's 64 MiB VMEM), add an N-tiling grid axis for Wv instead of keeping it resident.
    return cands[-1]


def _linear_concat_kernel(action_ref,     # (tm, 1)      int32     VMEM (pipelined over batch)
                          before_ref,     # (tm, V)      f32/bf16  VMEM (pipelined over batch)
                          wv_ref,         # (V, Np)      bf16      VMEM (resident)
                          wab_ref,        # (A_pad, Np)  bf16      VMEM (resident, bias folded)
                          pred_ref,       # (tm, Np)     out
                          *, a_pad):
    # Main MXU matmul, f32 accumulation.
    x = before_ref[...].astype(wv_ref.dtype)         # no-op if caller already streams bf16
    acc = jnp.dot(x, wv_ref[...], preferred_element_type=jnp.float32)

    # Vectorized action contribution: in-register one-hot (VPU) + tiny MXU dot, accumulated
    # directly into the f32 accumulator (no scratch, no extra VMEM pass).
    act = action_ref[...]                                               # (tm, 1) int32
    lanes = jax.lax.broadcasted_iota(jnp.int32, (act.shape[0], a_pad), 1)
    onehot = (lanes == act).astype(wab_ref.dtype)                       # (tm, a_pad) bf16
    acc = acc + jnp.dot(onehot, wab_ref[...], preferred_element_type=jnp.float32)

    pred_ref[...] = acc.astype(pred_ref.dtype)


def linear_concat_pred(before, action, wv_p, wab_p, *,
                       out_dtype=jnp.float32, single_buffer_weights=True):
    """pred_padded = before @ Wv + one_hot(action) @ (Wa + b); output lane-padded to (B, Np)."""
    B, V = before.shape
    Vw, Np = wv_p.shape
    assert Vw == V
    A_pad = wab_p.shape[0]

    action_i32 = action.reshape(B, 1).astype(jnp.int32)

    in_bytes = jnp.dtype(before.dtype).itemsize     # pass bf16 `before` to halve streamed bytes
    out_bytes = jnp.dtype(out_dtype).itemsize
    capacity = _vmem_capacity_bytes()
    tile_m = _choose_tile_m(B, V, Np, A_pad, in_bytes, out_bytes,
                            budget=int(0.75 * capacity))
    grid = (pl.cdiv(B, tile_m),)

    footprint = _footprint_bytes(tile_m, V, Np, A_pad, in_bytes, out_bytes)
    vmem_limit = int(min(capacity, max(32 << 20, footprint + (8 << 20))))

    weight_kwargs = (dict(pipeline_mode=pl.Buffered(buffer_count=1))
                     if single_buffer_weights else {})

    grid_spec = pltpu.PrefetchScalarGridSpec(
        num_scalar_prefetch=0,
        grid=grid,
        in_specs=[
            pl.BlockSpec((tile_m, 1), lambda i: (i, 0)),                        # action
            pl.BlockSpec((tile_m, V), lambda i: (i, 0)),                        # before
            pl.BlockSpec((V, Np), lambda i: (0, 0), **weight_kwargs),           # Wv  (resident)
            pl.BlockSpec((A_pad, Np), lambda i: (0, 0), **weight_kwargs),       # Wa+b (resident)
        ],
        out_specs=pl.BlockSpec((tile_m, Np), lambda i: (i, 0)),
    )

    cost = pl.CostEstimate(
        flops=2 * B * V * Np + 2 * B * A_pad * Np,
        transcendentals=0,
        bytes_accessed=(B * V * in_bytes + B * 4
                        + V * Np * 2 + A_pad * Np * 2 + B * Np * out_bytes))

    return pl.pallas_call(
        functools.partial(_linear_concat_kernel, a_pad=A_pad),
        out_shape=jax.ShapeDtypeStruct((B, Np), out_dtype),
        grid_spec=grid_spec,
        compiler_params=pltpu.CompilerParams(
            dimension_semantics=("parallel",),     # batch axis shards across TCs on v7x
            vmem_limit_bytes=vmem_limit),
        cost_estimate=cost,
    )(action_i32, before, wv_p, wab_p)


@functools.partial(jax.jit, static_argnames=("vec_size", "single_buffer_weights"))
def _pred_jit(before, action, wv_p, wab_p, *, vec_size, single_buffer_weights):
    pred = linear_concat_pred(before, action, wv_p, wab_p,
                              single_buffer_weights=single_buffer_weights)
    if pred.shape[1] != vec_size:
        pred = pred[:, :vec_size]          # slice of the lane padding fuses inside this jit
    return pred


def _pred(before, action, wv_p, wab_p, vec_size):
    try:
        return _pred_jit(before, action, wv_p, wab_p,
                         vec_size=vec_size, single_buffer_weights=True)
    except Exception:
        # pl.Buffered(1) (single-buffered resident weights) not supported on this jax
        # version -> fall back to default double-buffered weight blocks.
        return _pred_jit(before, action, wv_p, wab_p,
                         vec_size=vec_size, single_buffer_weights=False)


class LinearConcatVecT:
    """JAX/Pallas re-implementation of the PyTorch LinearConcatVecT (concat conditioning)."""

    def __init__(self, actions, vec_size, key, param_dtype=jnp.bfloat16):
        self.actions = set(actions)
        self.nr_actions = len(self.actions)
        self.vec_size = vec_size
        in_features = vec_size + self.nr_actions     # layer_sizes[0]
        out_features = vec_size                      # layer_sizes[-1]

        k_w, k_b = jax.random.split(key)
        # deterministic init mimicking nn.Linear: U(-1/sqrt(fan_in), 1/sqrt(fan_in))
        bound = 1.0 / jnp.sqrt(jnp.float32(in_features))
        w = jax.random.uniform(k_w, (out_features, in_features), jnp.float32, -bound, bound)
        b = jax.random.uniform(k_b, (out_features,), jnp.float32, -bound, bound)

        # f32 reference copies (split and transposed to x @ W layout)
        self.wv = w[:, :vec_size].T                  # (V, V)
        self.wa = w[:, vec_size:].T                  # (A, V)
        self.bias = b                                # (V,)

        # Kernel operands: bias folded into Wa, action dim padded to a sublane multiple,
        # lane dim padded to a multiple of 128, stored bf16 (f32 accumulation on the MXU).
        n_pad = _round_up(vec_size, _LANE)
        a_pad = _round_up(max(self.nr_actions, 1), _SUBLANE)
        self.out_padded = n_pad
        self.wv_p = jnp.pad(self.wv, ((0, 0), (0, n_pad - vec_size))).astype(param_dtype)
        self.wab_p = jnp.pad(self.wa + b[None, :],
                             ((0, a_pad - self.nr_actions),
                              (0, n_pad - vec_size))).astype(param_dtype)

    def __call__(self, before, action, after=None, negatives=None):
        # embed_visual == Identity, so before/after/negatives pass through unchanged.
        # NOTE: out-of-range action ids select a zero row (no bias); callers must pass valid ids.
        pred = _pred(before, action, self.wv_p, self.wab_p, self.vec_size)
        return before, pred, after, negatives


if __name__ == "__main__":
    key = jax.random.PRNGKey(0)
    k_model, k_before, k_after, k_neg, k_act = jax.random.split(key, 5)

    batch = 2
    vec_size = 32
    nr_actions = 4
    n_neg = 5

    model = LinearConcatVecT(set(range(nr_actions)), vec_size, k_model)

    before = jax.random.normal(k_before, (batch, vec_size), jnp.float32)
    after = jax.random.normal(k_after, (batch, vec_size), jnp.float32)
    negatives = jax.random.normal(k_neg, (batch, n_neg, vec_size), jnp.float32)
    action = jax.random.randint(k_act, (batch,), 0, nr_actions, jnp.int32)

    b_out, pred, a_out, neg_out = model(before, action, after, negatives)
    jax.block_until_ready(pred)

    # sanity check against a pure-JAX f32 reference of the PyTorch forward;
    # kernel weights are bf16 (f32 accumulation), so tolerance is loosened accordingly.
    onehot = jax.nn.one_hot(action, nr_actions, dtype=jnp.float32)
    x_cat = jnp.concatenate([before, onehot], axis=-1)
    w_full = jnp.concatenate([model.wv, model.wa], axis=0)       # (V+A, V)
    ref = x_cat @ w_full + model.bias

    assert pred.shape == (batch, vec_size)
    assert jnp.allclose(pred, ref, atol=2e-2, rtol=2e-2), float(jnp.max(jnp.abs(pred - ref)))
    assert b_out.shape == (batch, vec_size)
    assert a_out.shape == (batch, vec_size)
    assert neg_out.shape == (batch, n_neg, vec_size)

    print("KERNEL_OK")
</pallas_src>

<mosaic_0001>
module attributes {stable_mosaic.version = 11 : i64} {
  func.func @_linear_concat_kernel(%arg0: i32, %arg1: memref<2x1xi32, #tpu.memory_space<vmem>>, %arg2: memref<2x32xf32, #tpu.memory_space<vmem>>, %arg3: memref<32x128xbf16, #tpu.memory_space<vmem>>, %arg4: memref<8x128xbf16, #tpu.memory_space<vmem>>, %arg5: memref<2x128xf32, #tpu.memory_space<vmem>>) attributes {dimension_semantics = [#tpu.dimension_semantics<parallel>], iteration_bounds = array<i64: 1>, scalar_prefetch = 0 : i64, scratch_operands = 0 : i64, tpu.core_type = #tpu.core_type<tc>, window_params = [{transform_indices = @transform_0, window_bounds = array<i64: 2, 1>}, {transform_indices = @transform_1, window_bounds = array<i64: 2, 32>}, {pipeline_mode = #tpu.pipeline_mode<synchronous>, transform_indices = @transform_2, window_bounds = array<i64: 32, 128>}, {pipeline_mode = #tpu.pipeline_mode<synchronous>, transform_indices = @transform_3, window_bounds = array<i64: 8, 128>}, {transform_indices = @transform_4, window_bounds = array<i64: 2, 128>}]} {
    %c0 = arith.constant 0 : index
    %c0_0 = arith.constant 0 : index
    %0 = vector.load %arg2[%c0, %c0_0] : memref<2x32xf32, #tpu.memory_space<vmem>>, vector<2x32xf32>
    %1 = arith.truncf %0 : vector<2x32xf32> to vector<2x32xbf16>
    %c0_1 = arith.constant 0 : index
    %c0_2 = arith.constant 0 : index
    %2 = vector.load %arg3[%c0_1, %c0_2] : memref<32x128xbf16, #tpu.memory_space<vmem>>, vector<32x128xbf16>
    %cst = arith.constant dense<0.000000e+00> : vector<2x128xf32>
    %3 = tpu.matmul %1, %2, %cst {dimension_numbers = #tpu.dot_dimension_numbers<[1], [0], [0], [1], [0, 0, 1, 1], [], []>} : vector<2x32xbf16>, vector<32x128xbf16>, vector<2x128xf32> -> vector<2x128xf32>
    %c0_3 = arith.constant 0 : index
    %c0_4 = arith.constant 0 : index
    %4 = vector.load %arg1[%c0_3, %c0_4] : memref<2x1xi32, #tpu.memory_space<vmem>>, vector<2x1xi32>
    %5 = tpu.iota {dimensions = array<i32: 1>} : vector<2x8xi32>
    %6 = vector.broadcast %4 : vector<2x1xi32> to vector<2x8xi32>
    %7 = arith.cmpi eq, %5, %6 : vector<2x8xi32>
    %8 = arith.extui %7 : vector<2x8xi1> to vector<2x8xi32>
    %9 = arith.sitofp %8 : vector<2x8xi32> to vector<2x8xf32>
    %10 = arith.truncf %9 : vector<2x8xf32> to vector<2x8xbf16>
    %c0_5 = arith.constant 0 : index
    %c0_6 = arith.constant 0 : index
    %11 = vector.load %arg4[%c0_5, %c0_6] : memref<8x128xbf16, #tpu.memory_space<vmem>>, vector<8x128xbf16>
    %cst_7 = arith.constant dense<0.000000e+00> : vector<2x128xf32>
    %12 = tpu.matmul %10, %11, %cst_7 {dimension_numbers = #tpu.dot_dimension_numbers<[1], [0], [0], [1], [0, 0, 1, 1], [], []>} : vector<2x8xbf16>, vector<8x128xbf16>, vector<2x128xf32> -> vector<2x128xf32>
    %13 = arith.addf %3, %12 : vector<2x128xf32>
    %c0_8 = arith.constant 0 : index
    %c0_9 = arith.constant 0 : index
    %14 = vector.load %arg5[%c0_8, %c0_9] : memref<2x128xf32, #tpu.memory_space<vmem>>, vector<2x128xf32>
    tpu.vector_store %arg5[%c0_8, %c0_9], %13 {strides = array<i32>} : memref<2x128xf32, #tpu.memory_space<vmem>>, vector<2x128xf32>,
    return
  }
  func.func @transform_0(%arg0: i32) -> (i32, i32) {
    %c0_i32 = arith.constant 0 : i32
    %c0_i32_0 = arith.constant 0 : i32
    return %arg0, %c0_i32 : i32, i32
  }
  func.func @transform_1(%arg0: i32) -> (i32, i32) {
    %c0_i32 = arith.constant 0 : i32
    %c0_i32_0 = arith.constant 0 : i32
    return %arg0, %c0_i32 : i32, i32
  }
  func.func @transform_2(%arg0: i32) -> (i32, i32) {
    %c0_i32 = arith.constant 0 : i32
    %c0_i32_0 = arith.constant 0 : i32
    %c0_i32_1 = arith.constant 0 : i32
    return %c0_i32, %c0_i32_0 : i32, i32
  }
  func.func @transform_3(%arg0: i32) -> (i32, i32) {
    %c0_i32 = arith.constant 0 : i32
    %c0_i32_0 = arith.constant 0 : i32
    %c0_i32_1 = arith.constant 0 : i32
    return %c0_i32, %c0_i32_0 : i32, i32
  }
  func.func @transform_4(%arg0: i32) -> (i32, i32) {
    %c0_i32 = arith.constant 0 : i32
    %c0_i32_0 = arith.constant 0 : i32
    return %arg0, %c0_i32 : i32, i32
  }
}

module attributes {stable_mosaic.version = 11 : i64} {
  func.func @_linear_concat_kernel(%arg0: i32, %arg1: memref<2x1xi32, #tpu.memory_space<vmem>>, %arg2: memref<2x32xf32, #tpu.memory_space<vmem>>, %arg3: memref<32x128xbf16, #tpu.memory_space<vmem>>, %arg4: memref<8x128xbf16, #tpu.memory_space<vmem>>, %arg5: memref<2x128xf32, #tpu.memory_space<vmem>>) attributes {dimension_semantics = [#tpu.dimension_semantics<parallel>], iteration_bounds = array<i64: 1>, scalar_prefetch = 0 : i64, scratch_operands = 0 : i64, tpu.core_type = #tpu.core_type<tc>, window_params = [{transform_indices = @transform_0, window_bounds = array<i64: 2, 1>}, {transform_indices = @transform_1, window_bounds = array<i64: 2, 32>}, {pipeline_mode = #tpu.pipeline_mode<synchronous>, transform_indices = @transform_2, window_bounds = array<i64: 32, 128>}, {pipeline_mode = #tpu.pipeline_mode<synchronous>, transform_indices = @transform_3, window_bounds = array<i64: 8, 128>}, {transform_indices = @transform_4, window_bounds = array<i64: 2, 128>}]} {
    %c0 = arith.constant 0 : index
    %c0_0 = arith.constant 0 : index
    %0 = vector.load %arg2[%c0, %c0_0] : memref<2x32xf32, #tpu.memory_space<vmem>>, vector<2x32xf32>
    %1 = arith.truncf %0 : vector<2x32xf32> to vector<2x32xbf16>
    %c0_1 = arith.constant 0 : index
    %c0_2 = arith.constant 0 : index
    %2 = vector.load %arg3[%c0_1, %c0_2] : memref<32x128xbf16, #tpu.memory_space<vmem>>, vector<32x128xbf16>
    %cst = arith.constant dense<0.000000e+00> : vector<2x128xf32>
    %3 = tpu.matmul %1, %2, %cst {dimension_numbers = #tpu.dot_dimension_numbers<[1], [0], [0], [1], [0, 0, 1, 1], [], []>} : vector<2x32xbf16>, vector<32x128xbf16>, vector<2x128xf32> -> vector<2x128xf32>
    %c0_3 = arith.constant 0 : index
    %c0_4 = arith.constant 0 : index
    %4 = vector.load %arg1[%c0_3, %c0_4] : memref<2x1xi32, #tpu.memory_space<vmem>>, vector<2x1xi32>
    %5 = tpu.iota {dimensions = array<i32: 1>} : vector<2x8xi32>
    %6 = vector.broadcast %4 : vector<2x1xi32> to vector<2x8xi32>
    %7 = arith.cmpi eq, %5, %6 : vector<2x8xi32>
    %8 = arith.extui %7 : vector<2x8xi1> to vector<2x8xi32>
    %9 = arith.sitofp %8 : vector<2x8xi32> to vector<2x8xf32>
    %10 = arith.truncf %9 : vector<2x8xf32> to vector<2x8xbf16>
    %c0_5 = arith.constant 0 : index
    %c0_6 = arith.constant 0 : index
    %11 = vector.load %arg4[%c0_5, %c0_6] : memref<8x128xbf16, #tpu.memory_space<vmem>>, vector<8x128xbf16>
    %cst_7 = arith.constant dense<0.000000e+00> : vector<2x128xf32>
    %12 = tpu.matmul %10, %11, %cst_7 {dimension_numbers = #tpu.dot_dimension_numbers<[1], [0], [0], [1], [0, 0, 1, 1], [], []>} : vector<2x8xbf16>, vector<8x128xbf16>, vector<2x128xf32> -> vector<2x128xf32>
    %13 = arith.addf %3, %12 : vector<2x128xf32>
    %c0_8 = arith.constant 0 : index
    %c0_9 = arith.constant 0 : index
    %14 = vector.load %arg5[%c0_8, %c0_9] : memref<2x128xf32, #tpu.memory_space<vmem>>, vector<2x128xf32>
    tpu.vector_store %arg5[%c0_8, %c0_9], %13 {strides = array<i32>} : memref<2x128xf32, #tpu.memory_space<vmem>>, vector<2x128xf32>,
    return
  }
  func.func @transform_0(%arg0: i32) -> (i32, i32) {
    %c0_i32 = arith.constant 0 : i32
    %c0_i32_0 = arith.constant 0 : i32
    return %arg0, %c0_i32 : i32, i32
  }
  func.func @transform_1(%arg0: i32) -> (i32, i32) {
    %c0_i32 = arith.constant 0 : i32
    %c0_i32_0 = arith.constant 0 : i32
    return %arg0, %c0_i32 : i32, i32
  }
  func.func @transform_2(%arg0: i32) -> (i32, i32) {
    %c0_i32 = arith.constant 0 : i32
    %c0_i32_0 = arith.constant 0 : i32
    %c0_i32_1 = arith.constant 0 : i32
    return %c0_i32, %c0_i32_0 : i32, i32
  }
  func.func @transform_3(%arg0: i32) -> (i32, i32) {
    %c0_i32 = arith.constant 0 : i32
    %c0_i32_0 = arith.constant 0 : i32
    %c0_i32_1 = arith.constant 0 : i32
    return %c0_i32, %c0_i32_0 : i32, i32
  }
  func.func @transform_4(%arg0: i32) -> (i32, i32) {
    %c0_i32 = arith.constant 0 : i32
    %c0_i32_0 = arith.constant 0 : i32
    return %arg0, %c0_i32 : i32, i32
  }
}

</mosaic_0001>

<bundles_post_ra>
// kernel: _pred_jit.1
= control target key start
LH: loop header
LB: loop body
LE: loop exit
PB: predicated region body
PF: predicated region fallthrough
CT: control target
= control target key end

     0   :  { %9 = vsyncpa [#allocation3], 0  ;;  %s295_s0 = inlined_call_operand.vmem [shape: s32[2,1], index: 0, kind: input, shape index: {}]   ;;  %s296_s1 = inlined_call_operand.vmem [shape: f32[2,32], index: 1, kind: input, shape index: {}]   ;;  %s297_s2 = inlined_call_operand.hbm [shape: bf16[32,128], index: 2, kind: input, shape index: {}]   ;;  %s298_s3 = inlined_call_operand.vmem [shape: bf16[8,128], index: 3, kind: input, shape index: {}]   ;;  %s299_s4 = inlined_call_operand.hbm [shape: f32[2,128], index: 4, kind: output, shape index: {}]  }
   0x1   :  { %10 = vsyncpa [#allocation4], 0  ;;  %s248_s15 = smov [#allocation2]  }
   0x2   :  { %s20_s16 = sshll.u32 %s248_s15, 4  ;;  %s21_s16 = int_to_ptr.vmem [resolvable:$true] %s20_s16 }
   0x3   :  { %s212_s17 = scalar_lea.vmem %s21_s16, 256  ;;  %p217_p1 = scmp.lt.s32.totalorder %s21_s16, %s21_s16 }
   0x4   :  { %p213_p0 = scmp.ne.s32.totalorder %s21_s16, %s212_s17  ;;  %p218_p2 = scmp.lt.s32.totalorder %s212_s17, %s212_s17 }
   0x6   :  { %p219_p3 = por %p218_p2, %p217_p1 }
   0x8   :  { %p220_p4 = pnand %p219_p3, %p213_p0 }
   0xa   :  { %223 = shalt.err (!%p220_p4)
}
   0xb   :  { %s249_s18 = smov 64   ;;  %s250_s19 = smov 4  }
   0xc   :  { %26 = dma.hbm_to_vmem [thread:$0]  %s297_s2, 256, %s21_s16, [#allocation3], %s249_s18, %s249_s18, %s250_s19  }
   0xd   :  { %244 = dma.done.wait [#allocation3], 256  }
   0xe   :  { %245 = vsyncadd [#allocation3], 4294967040  ;;  %v251_v0 = vmov 0   ;;  %v252_v1 = vmov 0.0   ;;  %vm253_vm0 = vmmov 0   ;;  %vm54_vm1 = vcmask 1043456  }
   0xf   :  { %201 = vset.pattern.permute.xlu0 %v251_v0  ;;  %186 = vmatprep.subr.bf16.mxu1 %v252_v1  ;;  %v39_v2 = vld [vmem:[%s295_s0] sm:$0x3]  ;;  %v202_v3 = vld [vmem:[#allocation2 + $0x8] sm:$0xff]   ;;  %vm110_vm2 = vcmask 261120   ;;  %v40_v9 = vlaneseq  ;;  %vm50_vm4 = vcmask 64512   ;;  %s254_s0 = smov [#allocation5]  }
  0x10   :  { %190 = vmatprep.mubr.msk.bf16.mxu1 %vm253_vm0, %v252_v1  ;;  %180 = vmatprep.subr.bf16.mxu0 %v252_v1  ;;  %v49_v4 = vld [vmem:[%s298_s3] sm:$0xf] }
  0x11   :  { %182 = vmatprep.mubr.msk.bf16.mxu0 %vm253_vm0, %v252_v1  ;;  %43 = vperm.xlu0 %201, %v39_v2   ;;  %v203_v5 = vld [vmem:[#allocation2] sm:$0xff]   ;;  %v56_v7 = vsel %vm54_vm1, %v49_v4, 0  ;;  %v41_v10 = vand.u32 127, %v40_v9 }
  0x12   :  { %187 = vmatpush3.bf16.msra.mxu1 %v202_v3  ;;  %v33_v6 = vld [vmem:[%s296_s1] sm:$0x3]  ;;  %181 = vmatpush3.bf16.msra.mxu0 %v56_v7  ;;  %s161_s1 = sshll.u32 %s254_s0, 4  ;;  %s162_s1 = int_to_ptr.vmem [resolvable:$true] %s161_s1 }
  0x13   :  { %188 = vmatprep.subr.bf16.mxu1 %v252_v1  ;;  %v34_v8 = vpack.c.bf16 %v33_v6, %v33_v6  ;;  %s224_s3 = scalar_lea.vmem %s162_s1, 32  ;;  %p229_p6 = scmp.lt.s32.totalorder %s162_s1, %s162_s1 }
  0x14   :  { %p225_p5 = scmp.ne.s32.totalorder %s162_s1, %s224_s3  ;;  %p230_p7 = scmp.lt.s32.totalorder %s224_s3, %s224_s3 }
  0x16   :  { %189 = vmatpush3.bf16.msra.mxu1 %v203_v5  ;;  %p231_p8 = por %p230_p7, %p229_p6 }
  0x18   :  { %p232_p9 = pnand %p231_p8, %p225_p5 }
  0x19   :  { %191 = vmatmul.mubr.msk.bf16.vlgmr.msra.gmra.mxu1 %vm110_vm2, %v34_v8 }
  0x8c   :  { %v44_v11 = vpop.permute.xlu0 %43 }
  0x8d   :  { %vm45_vm3 = vcmp.eq.s32.totalorder %v41_v10, %v44_v11 }
  0x8e   :  { %v170_v12 = vsel %vm45_vm3, 1.0, %v252_v1 }
  0x8f   :  { %v48_v13 = vpack.c.bf16 %v170_v12, %v170_v12 }
  0x91   :  { %183 = vmatmul.mubr.msk.bf16.vlgmr.msra.gmra.mxu0 %vm50_vm4, %v48_v13 }
  0xd9   :  { %v148_v14 = vpop.f32.mrf.mxu1 }
  0xdb   :  { %v192_v15 = vpop.f32.mrf.mxu1 }
  0xdd   :  { %v151_v16 = vpop.f32.mrf.mxu1 }
  0xdf   :  { %v193_v17 = vpop.f32.mrf.mxu1 }
 0x151   :  { %v92_v18 = vpop.f32.mrf.mxu0 }
 0x152   :  { %v149_v19 = vadd.f32 %v148_v14, %v92_v18 }
 0x153   :  { %v184_v20 = vpop.f32.mrf.mxu0 }
 0x154   :  { %154 = vst [vmem:[#allocation5] sm:$0x3] %v149_v19 }
 0x155   :  { %v95_v21 = vpop.f32.mrf.mxu0 }
 0x156   :  { %235 = shalt.err (!%p232_p9)
}
 0x157   :  { %164 = dma.vmem_to_hbm [thread:$0]  %s162_s1, 32, %s299_s4, [#allocation4]   ;;  %v185_v22 = vpop.f32.mrf.mxu0 }
 0x158   :  { %246 = dma.done.wait [#allocation4], 32  }
 0x159   :  { %247 = vsyncadd [#allocation4], 4294967264 }
 0x15a   :  { %168 = vsyncpa [#allocation3], 1 }
 0x15b   :  { %169 = vsyncpa [#allocation4], 1 }

// kernel: _pred_jit.1
= control target key start
LH: loop header
LB: loop body
LE: loop exit
PB: predicated region body
PF: predicated region fallthrough
CT: control target
= control target key end

     0   :  { %9 = vsyncpa [#allocation3], 0  ;;  %s295_s0 = inlined_call_operand.vmem [shape: s32[2,1], index: 0, kind: input, shape index: {}]   ;;  %s296_s1 = inlined_call_operand.vmem [shape: f32[2,32], index: 1, kind: input, shape index: {}]   ;;  %s297_s2 = inlined_call_operand.hbm [shape: bf16[32,128], index: 2, kind: input, shape index: {}]   ;;  %s298_s3 = inlined_call_operand.vmem [shape: bf16[8,128], index: 3, kind: input, shape index: {}]   ;;  %s299_s4 = inlined_call_operand.hbm [shape: f32[2,128], index: 4, kind: output, shape index: {}]  }
   0x1   :  { %10 = vsyncpa [#allocation4], 0  ;;  %s248_s15 = smov [#allocation2]  }
   0x2   :  { %s20_s16 = sshll.u32 %s248_s15, 4  ;;  %s21_s16 = int_to_ptr.vmem [resolvable:$true] %s20_s16 }
   0x3   :  { %s212_s17 = scalar_lea.vmem %s21_s16, 256  ;;  %p217_p1 = scmp.lt.s32.totalorder %s21_s16, %s21_s16 }
   0x4   :  { %p213_p0 = scmp.ne.s32.totalorder %s21_s16, %s212_s17  ;;  %p218_p2 = scmp.lt.s32.totalorder %s212_s17, %s212_s17 }
   0x6   :  { %p219_p3 = por %p218_p2, %p217_p1 }
   0x8   :  { %p220_p4 = pnand %p219_p3, %p213_p0 }
   0xa   :  { %223 = shalt.err (!%p220_p4)
}
   0xb   :  { %s249_s18 = smov 64   ;;  %s250_s19 = smov 4  }
   0xc   :  { %26 = dma.hbm_to_vmem [thread:$0]  %s297_s2, 256, %s21_s16, [#allocation3], %s249_s18, %s249_s18, %s250_s19  }
   0xd   :  { %244 = dma.done.wait [#allocation3], 256  }
   0xe   :  { %245 = vsyncadd [#allocation3], 4294967040  ;;  %v251_v0 = vmov 0   ;;  %v252_v1 = vmov 0.0   ;;  %vm253_vm0 = vmmov 0   ;;  %vm54_vm1 = vcmask 1043456  }
   0xf   :  { %201 = vset.pattern.permute.xlu0 %v251_v0  ;;  %186 = vmatprep.subr.bf16.mxu1 %v252_v1  ;;  %v39_v2 = vld [vmem:[%s295_s0] sm:$0x3]  ;;  %v202_v3 = vld [vmem:[#allocation2 + $0x8] sm:$0xff]   ;;  %vm110_vm2 = vcmask 261120   ;;  %v40_v9 = vlaneseq  ;;  %vm50_vm4 = vcmask 64512   ;;  %s254_s0 = smov [#allocation5]  }
  0x10   :  { %190 = vmatprep.mubr.msk.bf16.mxu1 %vm253_vm0, %v252_v1  ;;  %180 = vmatprep.subr.bf16.mxu0 %v252_v1  ;;  %v49_v4 = vld [vmem:[%s298_s3] sm:$0xf] }
  0x11   :  { %182 = vmatprep.mubr.msk.bf16.mxu0 %vm253_vm0, %v252_v1  ;;  %43 = vperm.xlu0 %201, %v39_v2   ;;  %v203_v5 = vld [vmem:[#allocation2] sm:$0xff]   ;;  %v56_v7 = vsel %vm54_vm1, %v49_v4, 0  ;;  %v41_v10 = vand.u32 127, %v40_v9 }
  0x12   :  { %187 = vmatpush3.bf16.msra.mxu1 %v202_v3  ;;  %v33_v6 = vld [vmem:[%s296_s1] sm:$0x3]  ;;  %181 = vmatpush3.bf16.msra.mxu0 %v56_v7  ;;  %s161_s1 = sshll.u32 %s254_s0, 4  ;;  %s162_s1 = int_to_ptr.vmem [resolvable:$true] %s161_s1 }
  0x13   :  { %188 = vmatprep.subr.bf16.mxu1 %v252_v1  ;;  %v34_v8 = vpack.c.bf16 %v33_v6, %v33_v6  ;;  %s224_s3 = scalar_lea.vmem %s162_s1, 32  ;;  %p229_p6 = scmp.lt.s32.totalorder %s162_s1, %s162_s1 }
  0x14   :  { %p225_p5 = scmp.ne.s32.totalorder %s162_s1, %s224_s3  ;;  %p230_p7 = scmp.lt.s32.totalorder %s224_s3, %s224_s3 }
  0x16   :  { %189 = vmatpush3.bf16.msra.mxu1 %v203_v5  ;;  %p231_p8 = por %p230_p7, %p229_p6 }
  0x18   :  { %p232_p9 = pnand %p231_p8, %p225_p5 }
  0x19   :  { %191 = vmatmul.mubr.msk.bf16.vlgmr.msra.gmra.mxu1 %vm110_vm2, %v34_v8 }
  0x8c   :  { %v44_v11 = vpop.permute.xlu0 %43 }
  0x8d   :  { %vm45_vm3 = vcmp.eq.s32.totalorder %v41_v10, %v44_v11 }
  0x8e   :  { %v170_v12 = vsel %vm45_vm3, 1.0, %v252_v1 }
  0x8f   :  { %v48_v13 = vpack.c.bf16 %v170_v12, %v170_v12 }
  0x91   :  { %183 = vmatmul.mubr.msk.bf16.vlgmr.msra.gmra.mxu0 %vm50_vm4, %v48_v13 }
  0xd9   :  { %v148_v14 = vpop.f32.mrf.mxu1 }
  0xdb   :  { %v192_v15 = vpop.f32.mrf.mxu1 }
  0xdd   :  { %v151_v16 = vpop.f32.mrf.mxu1 }
  0xdf   :  { %v193_v17 = vpop.f32.mrf.mxu1 }
 0x151   :  { %v92_v18 = vpop.f32.mrf.mxu0 }
 0x152   :  { %v149_v19 = vadd.f32 %v148_v14, %v92_v18 }
 0x153   :  { %v184_v20 = vpop.f32.mrf.mxu0 }
 0x154   :  { %154 = vst [vmem:[#allocation5] sm:$0x3] %v149_v19 }
 0x155   :  { %v95_v21 = vpop.f32.mrf.mxu0 }
 0x156   :  { %235 = shalt.err (!%p232_p9)
}
 0x157   :  { %164 = dma.vmem_to_hbm [thread:$0]  %s162_s1, 32, %s299_s4, [#allocation4]   ;;  %v185_v22 = vpop.f32.mrf.mxu0 }
 0x158   :  { %246 = dma.done.wait [#allocation4], 32  }
 0x159   :  { %247 = vsyncadd [#allocation4], 4294967264 }
 0x15a   :  { %168 = vsyncpa [#allocation3], 1 }
 0x15b   :  { %169 = vsyncpa [#allocation4], 1 }

</bundles_post_ra>
